<compile_context>
chip_gen: v7x
topology: tpu7x:2x2x1
jax: 0.10.0
libtpu: 0.0.40
codegen_flags: <defaults>
</compile_context>

<pallas_src>
import functools

import jax
import jax.numpy as jnp
from jax import lax
from jax.experimental import pallas as pl
from jax.experimental.pallas import tpu as pltpu

LRELU_SLOPE = 0.1
KERNEL_SIZE = 3
DILATIONS = (1, 3, 5)


def _resblock_kernel(x_ref, m_ref, w1_ref, b1_ref, w2_ref, b2_ref, o_ref, *,
                     dilations):
    x = x_ref[...]                                        # (C, T) f32
    C, T = x.shape
    mask = jnp.broadcast_to(m_ref[...], (C, T))           # hoisted once
    col = lax.broadcasted_iota(jnp.int32, (C, T), 1)      # hoisted once

    def leaky(v):
        return jnp.where(v > 0, v, LRELU_SLOPE * v)

    def conv(v, w, b, d):
        # 'same'-padded dilated Conv1d (k=3, stride=1, padding=d):
        #   y[:, t] = W0 @ v[:, t-d] + W1 @ v[:, t] + W2 @ v[:, t+d] + b
        # Shifted copies via XLU roll + lane mask (zero padding), stacked on
        # sublanes so the whole conv is a single MXU matmul with K = 3*C.
        prev = jnp.where(col >= d, pltpu.roll(v, shift=d, axis=1), 0.0)
        nxt = jnp.where(col < T - d, pltpu.roll(v, shift=T - d, axis=1), 0.0)
        taps = jnp.concatenate([prev, v, nxt], axis=0)     # (3C, T)
        y = jnp.dot(w, taps, preferred_element_type=jnp.float32)
        return y + b                                       # b: (C, 1)

    for l, d in enumerate(dilations):
        xt = leaky(x) * mask
        xt = conv(xt, w1_ref[l], b1_ref[l], d)             # dilated conv
        xt = leaky(xt) * mask
        xt = conv(xt, w2_ref[l], b2_ref[l], 1)             # dilation-1 conv
        x = xt + x                                         # residual
    o_ref[...] = x * mask


def weight_norm_conv1d_weight(v, g):
    """PyTorch weight_norm (dim=0): w = g * v / ||v||, norm per output channel."""
    norm = jnp.sqrt(jnp.sum(v * v, axis=(1, 2), keepdims=True))
    return g * v / norm


def dilated_res_block(x, x_mask, w1, b1, w2, b2, *, dilations=DILATIONS):
    """x: (B, C, T) f32; x_mask: (B, 1, T) or None.
    w1, w2: (n_layers, C, C, K) effective conv weights (weight_norm folded in).
    b1, b2: (n_layers, C) conv biases.  Returns (B, C, T) f32."""
    B, C, T = x.shape
    n = len(dilations)
    assert w1.shape == (n, C, C, KERNEL_SIZE)
    assert w2.shape == (n, C, C, KERNEL_SIZE)
    if x_mask is None:
        x_mask = jnp.ones((B, 1, T), jnp.float32)

    # (layer, co, ci, k) -> (layer, co, k*C + ci): taps stacked on the
    # contraction axis so each conv is one matmul in the kernel.
    w1_cat = jnp.transpose(w1, (0, 1, 3, 2)).reshape(n, C, KERNEL_SIZE * C)
    w2_cat = jnp.transpose(w2, (0, 1, 3, 2)).reshape(n, C, KERNEL_SIZE * C)
    b1_col = b1.reshape(n, C, 1).astype(jnp.float32)
    b2_col = b2.reshape(n, C, 1).astype(jnp.float32)

    kernel = functools.partial(_resblock_kernel, dilations=tuple(dilations))
    return pl.pallas_call(
        kernel,
        out_shape=jax.ShapeDtypeStruct((B, C, T), jnp.float32),
        grid=(B,),
        in_specs=[
            pl.BlockSpec((None, C, T), lambda b: (b, 0, 0)),
            pl.BlockSpec((None, 1, T), lambda b: (b, 0, 0)),
            pl.BlockSpec((n, C, KERNEL_SIZE * C), lambda b: (0, 0, 0)),
            pl.BlockSpec((n, C, 1), lambda b: (0, 0, 0)),
            pl.BlockSpec((n, C, KERNEL_SIZE * C), lambda b: (0, 0, 0)),
            pl.BlockSpec((n, C, 1), lambda b: (0, 0, 0)),
        ],
        out_specs=pl.BlockSpec((None, C, T), lambda b: (b, 0, 0)),
        compiler_params=pltpu.CompilerParams(
            dimension_semantics=("parallel",)),
    )(x.astype(jnp.float32), x_mask.astype(jnp.float32),
      w1_cat.astype(jnp.float32), b1_col, w2_cat.astype(jnp.float32), b2_col)


def _reference_forward(x, x_mask, w1, b1, w2, b2, dilations=DILATIONS):
    """Pure-JAX reference mirroring the PyTorch forward (for correctness)."""
    def conv1d(v, w, b, d):
        y = lax.conv_general_dilated(
            v, w, window_strides=(1,), padding=[(d, d)], rhs_dilation=(d,),
            dimension_numbers=("NCH", "OIH", "NCH"),
            precision=lax.Precision.HIGHEST)
        return y + b[None, :, None]

    for l, d in enumerate(dilations):
        xt = jnp.where(x > 0, x, LRELU_SLOPE * x) * x_mask
        xt = conv1d(xt, w1[l], b1[l], d)
        xt = jnp.where(xt > 0, xt, LRELU_SLOPE * xt) * x_mask
        xt = conv1d(xt, w2[l], b2[l], 1)
        x = xt + x
    return x * x_mask


if __name__ == "__main__":
    B, C, T = 2, 32, 128     # small shapes: batch=2, channels=32, seq=128 (lane-dense)
    key = jax.random.PRNGKey(0)
    keys = jax.random.split(key, 20)

    x = jax.random.normal(keys[0], (B, C, T), jnp.float32)
    lengths = jnp.array([T, (3 * T) // 4], jnp.int32)
    x_mask = (jnp.arange(T)[None, :] < lengths[:, None]).astype(jnp.float32)
    x_mask = x_mask[:, None, :]                            # (B, 1, T)

    # weight_norm Conv1d parameters (v, g, bias) for convs1 / convs2, 3 layers.
    w1_list, b1_list, w2_list, b2_list = [], [], [], []
    ki = 1
    for _ in range(len(DILATIONS)):
        v1 = 0.01 * jax.random.normal(keys[ki], (C, C, KERNEL_SIZE), jnp.float32); ki += 1
        g1 = 0.3 * (1.0 + 0.1 * jax.random.normal(keys[ki], (C, 1, 1), jnp.float32)); ki += 1
        c1b = 0.01 * jax.random.normal(keys[ki], (C,), jnp.float32); ki += 1
        v2 = 0.01 * jax.random.normal(keys[ki], (C, C, KERNEL_SIZE), jnp.float32); ki += 1
        g2 = 0.3 * (1.0 + 0.1 * jax.random.normal(keys[ki], (C, 1, 1), jnp.float32)); ki += 1
        c2b = 0.01 * jax.random.normal(keys[ki], (C,), jnp.float32); ki += 1
        w1_list.append(weight_norm_conv1d_weight(v1, g1)); b1_list.append(c1b)
        w2_list.append(weight_norm_conv1d_weight(v2, g2)); b2_list.append(c2b)

    w1 = jnp.stack(w1_list)    # (3, C, C, 3) effective (weight-normed) weights
    w2 = jnp.stack(w2_list)
    b1 = jnp.stack(b1_list)    # (3, C)
    b2 = jnp.stack(b2_list)

    out = dilated_res_block(x, x_mask, w1, b1, w2, b2)
    jax.block_until_ready(out)

    ref = _reference_forward(x, x_mask, w1, b1, w2, b2)
    err = float(jnp.max(jnp.abs(out - ref)))
    assert out.shape == (B, C, T) and out.dtype == jnp.float32
    assert err < 2e-2, f"max abs err vs reference = {err}"
    print("KERNEL_OK")
</pallas_src>

<mosaic_0001>
module attributes {stable_mosaic.version = 11 : i64} {
  func.func @_resblock_kernel(%arg0: i32, %arg1: memref<1x32x128xf32, #tpu.memory_space<vmem>>, %arg2: memref<1x1x128xf32, #tpu.memory_space<vmem>>, %arg3: memref<3x32x96xf32, #tpu.memory_space<vmem>>, %arg4: memref<3x32x1xf32, #tpu.memory_space<vmem>>, %arg5: memref<3x32x96xf32, #tpu.memory_space<vmem>>, %arg6: memref<3x32x1xf32, #tpu.memory_space<vmem>>, %arg7: memref<1x32x128xf32, #tpu.memory_space<vmem>>) attributes {dimension_semantics = [#tpu.dimension_semantics<parallel>], iteration_bounds = array<i64: 2>, scalar_prefetch = 0 : i64, scratch_operands = 0 : i64, tpu.core_type = #tpu.core_type<tc>, window_params = [{transform_indices = @transform_0, window_bounds = array<i64: 1, 32, 128>}, {transform_indices = @transform_1, window_bounds = array<i64: 1, 1, 128>}, {pipeline_mode = #tpu.pipeline_mode<synchronous>, transform_indices = @transform_2, window_bounds = array<i64: 3, 32, 96>}, {pipeline_mode = #tpu.pipeline_mode<synchronous>, transform_indices = @transform_3, window_bounds = array<i64: 3, 32, 1>}, {pipeline_mode = #tpu.pipeline_mode<synchronous>, transform_indices = @transform_4, window_bounds = array<i64: 3, 32, 96>}, {pipeline_mode = #tpu.pipeline_mode<synchronous>, transform_indices = @transform_5, window_bounds = array<i64: 3, 32, 1>}, {transform_indices = @transform_6, window_bounds = array<i64: 1, 32, 128>}]} {
    %c0 = arith.constant 0 : index
    %c0_0 = arith.constant 0 : index
    %c0_1 = arith.constant 0 : index
    %0 = vector.load %arg1[%c0, %c0_0, %c0_1] : memref<1x32x128xf32, #tpu.memory_space<vmem>>, vector<1x32x128xf32>
    %1 = vector.shape_cast %0 : vector<1x32x128xf32> to vector<32x128xf32>
    %c0_2 = arith.constant 0 : index
    %c0_3 = arith.constant 0 : index
    %c0_4 = arith.constant 0 : index
    %2 = vector.load %arg2[%c0_2, %c0_3, %c0_4] : memref<1x1x128xf32, #tpu.memory_space<vmem>>, vector<1x1x128xf32>
    %3 = vector.shape_cast %2 : vector<1x1x128xf32> to vector<1x128xf32>
    %4 = vector.shape_cast %3 : vector<1x128xf32> to vector<1x128xf32>
    %5 = vector.broadcast %4 : vector<1x128xf32> to vector<32x128xf32>
    %6 = tpu.iota {dimensions = array<i32: 1>} : vector<32x128xi32>
    %cst = arith.constant 0.000000e+00 : f32
    %7 = vector.broadcast %cst : f32 to vector<32x128xf32>
    %8 = arith.cmpf ogt, %1, %7 : vector<32x128xf32>
    %cst_5 = arith.constant 1.000000e-01 : f32
    %9 = vector.broadcast %cst_5 : f32 to vector<32x128xf32>
    %10 = arith.mulf %9, %1 : vector<32x128xf32>
    %11 = arith.select %8, %1, %10 : vector<32x128xi1>, vector<32x128xf32>
    %12 = arith.mulf %11, %5 : vector<32x128xf32>
    %c0_6 = arith.constant 0 : index
    %c0_7 = arith.constant 0 : index
    %c0_8 = arith.constant 0 : index
    %13 = vector.load %arg3[%c0_6, %c0_7, %c0_8] : memref<3x32x96xf32, #tpu.memory_space<vmem>>, vector<1x32x96xf32>
    %14 = vector.shape_cast %13 : vector<1x32x96xf32> to vector<32x96xf32>
    %c0_9 = arith.constant 0 : index
    %c0_10 = arith.constant 0 : index
    %c0_11 = arith.constant 0 : index
    %15 = vector.load %arg4[%c0_9, %c0_10, %c0_11] : memref<3x32x1xf32, #tpu.memory_space<vmem>>, vector<1x32x1xf32>
    %16 = vector.shape_cast %15 : vector<1x32x1xf32> to vector<32x1xf32>
    %c1_i32 = arith.constant 1 : i32
    %17 = vector.broadcast %c1_i32 : i32 to vector<32x128xi32>
    %18 = arith.cmpi sge, %6, %17 : vector<32x128xi32>
    %c1_i32_12 = arith.constant 1 : i32
    %19 = tpu.dynamic_rotate %12 by %c1_i32_12 dim 1 : vector<32x128xf32>, i32 -> vector<32x128xf32>
    %cst_13 = arith.constant 0.000000e+00 : f32
    %20 = vector.broadcast %cst_13 : f32 to vector<32x128xf32>
    %21 = arith.select %18, %19, %20 : vector<32x128xi1>, vector<32x128xf32>
    %c127_i32 = arith.constant 127 : i32
    %22 = vector.broadcast %c127_i32 : i32 to vector<32x128xi32>
    %23 = arith.cmpi slt, %6, %22 : vector<32x128xi32>
    %c127_i32_14 = arith.constant 127 : i32
    %24 = tpu.dynamic_rotate %12 by %c127_i32_14 dim 1 : vector<32x128xf32>, i32 -> vector<32x128xf32>
    %cst_15 = arith.constant 0.000000e+00 : f32
    %25 = vector.broadcast %cst_15 : f32 to vector<32x128xf32>
    %26 = arith.select %23, %24, %25 : vector<32x128xi1>, vector<32x128xf32>
    %27 = tpu.concatenate %21, %12, %26 in 0 : vector<32x128xf32>, vector<32x128xf32>, vector<32x128xf32> -> vector<96x128xf32>
    %cst_16 = arith.constant dense<0.000000e+00> : vector<32x128xf32>
    %28 = tpu.matmul %14, %27, %cst_16 {dimension_numbers = #tpu.dot_dimension_numbers<[1], [0], [0], [1], [0, 0, 1, 1], [], []>} : vector<32x96xf32>, vector<96x128xf32>, vector<32x128xf32> -> vector<32x128xf32>
    %29 = vector.broadcast %16 : vector<32x1xf32> to vector<32x128xf32>
    %30 = arith.addf %28, %29 : vector<32x128xf32>
    %cst_17 = arith.constant 0.000000e+00 : f32
    %31 = vector.broadcast %cst_17 : f32 to vector<32x128xf32>
    %32 = arith.cmpf ogt, %30, %31 : vector<32x128xf32>
    %cst_18 = arith.constant 1.000000e-01 : f32
    %33 = vector.broadcast %cst_18 : f32 to vector<32x128xf32>
    %34 = arith.mulf %33, %30 : vector<32x128xf32>
    %35 = arith.select %32, %30, %34 : vector<32x128xi1>, vector<32x128xf32>
    %36 = arith.mulf %35, %5 : vector<32x128xf32>
    %c0_19 = arith.constant 0 : index
    %c0_20 = arith.constant 0 : index
    %c0_21 = arith.constant 0 : index
    %37 = vector.load %arg5[%c0_19, %c0_20, %c0_21] : memref<3x32x96xf32, #tpu.memory_space<vmem>>, vector<1x32x96xf32>
    %38 = vector.shape_cast %37 : vector<1x32x96xf32> to vector<32x96xf32>
    %c0_22 = arith.constant 0 : index
    %c0_23 = arith.constant 0 : index
    %c0_24 = arith.constant 0 : index
    %39 = vector.load %arg6[%c0_22, %c0_23, %c0_24] : memref<3x32x1xf32, #tpu.memory_space<vmem>>, vector<1x32x1xf32>
    %40 = vector.shape_cast %39 : vector<1x32x1xf32> to vector<32x1xf32>
    %c1_i32_25 = arith.constant 1 : i32
    %41 = vector.broadcast %c1_i32_25 : i32 to vector<32x128xi32>
    %42 = arith.cmpi sge, %6, %41 : vector<32x128xi32>
    %c1_i32_26 = arith.constant 1 : i32
    %43 = tpu.dynamic_rotate %36 by %c1_i32_26 dim 1 : vector<32x128xf32>, i32 -> vector<32x128xf32>
    %cst_27 = arith.constant 0.000000e+00 : f32
    %44 = vector.broadcast %cst_27 : f32 to vector<32x128xf32>
    %45 = arith.select %42, %43, %44 : vector<32x128xi1>, vector<32x128xf32>
    %c127_i32_28 = arith.constant 127 : i32
    %46 = vector.broadcast %c127_i32_28 : i32 to vector<32x128xi32>
    %47 = arith.cmpi slt, %6, %46 : vector<32x128xi32>
    %c127_i32_29 = arith.constant 127 : i32
    %48 = tpu.dynamic_rotate %36 by %c127_i32_29 dim 1 : vector<32x128xf32>, i32 -> vector<32x128xf32>
    %cst_30 = arith.constant 0.000000e+00 : f32
    %49 = vector.broadcast %cst_30 : f32 to vector<32x128xf32>
    %50 = arith.select %47, %48, %49 : vector<32x128xi1>, vector<32x128xf32>
    %51 = tpu.concatenate %45, %36, %50 in 0 : vector<32x128xf32>, vector<32x128xf32>, vector<32x128xf32> -> vector<96x128xf32>
    %cst_31 = arith.constant dense<0.000000e+00> : vector<32x128xf32>
    %52 = tpu.matmul %38, %51, %cst_31 {dimension_numbers = #tpu.dot_dimension_numbers<[1], [0], [0], [1], [0, 0, 1, 1], [], []>} : vector<32x96xf32>, vector<96x128xf32>, vector<32x128xf32> -> vector<32x128xf32>
    %53 = vector.broadcast %40 : vector<32x1xf32> to vector<32x128xf32>
    %54 = arith.addf %52, %53 : vector<32x128xf32>
    %55 = arith.addf %54, %1 : vector<32x128xf32>
    %cst_32 = arith.constant 0.000000e+00 : f32
    %56 = vector.broadcast %cst_32 : f32 to vector<32x128xf32>
    %57 = arith.cmpf ogt, %55, %56 : vector<32x128xf32>
    %cst_33 = arith.constant 1.000000e-01 : f32
    %58 = vector.broadcast %cst_33 : f32 to vector<32x128xf32>
    %59 = arith.mulf %58, %55 : vector<32x128xf32>
    %60 = arith.select %57, %55, %59 : vector<32x128xi1>, vector<32x128xf32>
    %61 = arith.mulf %60, %5 : vector<32x128xf32>
    %c1 = arith.constant 1 : index
    %c0_34 = arith.constant 0 : index
    %c0_35 = arith.constant 0 : index
    %62 = vector.load %arg3[%c1, %c0_34, %c0_35] : memref<3x32x96xf32, #tpu.memory_space<vmem>>, vector<1x32x96xf32>
    %63 = vector.shape_cast %62 : vector<1x32x96xf32> to vector<32x96xf32>
    %c1_36 = arith.constant 1 : index
    %c0_37 = arith.constant 0 : index
    %c0_38 = arith.constant 0 : index
    %64 = vector.load %arg4[%c1_36, %c0_37, %c0_38] : memref<3x32x1xf32, #tpu.memory_space<vmem>>, vector<1x32x1xf32>
    %65 = vector.shape_cast %64 : vector<1x32x1xf32> to vector<32x1xf32>
    %c3_i32 = arith.constant 3 : i32
    %66 = vector.broadcast %c3_i32 : i32 to vector<32x128xi32>
    %67 = arith.cmpi sge, %6, %66 : vector<32x128xi32>
    %c3_i32_39 = arith.constant 3 : i32
    %68 = tpu.dynamic_rotate %61 by %c3_i32_39 dim 1 : vector<32x128xf32>, i32 -> vector<32x128xf32>
    %cst_40 = arith.constant 0.000000e+00 : f32
    %69 = vector.broadcast %cst_40 : f32 to vector<32x128xf32>
    %70 = arith.select %67, %68, %69 : vector<32x128xi1>, vector<32x128xf32>
    %c125_i32 = arith.constant 125 : i32
    %71 = vector.broadcast %c125_i32 : i32 to vector<32x128xi32>
    %72 = arith.cmpi slt, %6, %71 : vector<32x128xi32>
    %c125_i32_41 = arith.constant 125 : i32
    %73 = tpu.dynamic_rotate %61 by %c125_i32_41 dim 1 : vector<32x128xf32>, i32 -> vector<32x128xf32>
    %cst_42 = arith.constant 0.000000e+00 : f32
    %74 = vector.broadcast %cst_42 : f32 to vector<32x128xf32>
    %75 = arith.select %72, %73, %74 : vector<32x128xi1>, vector<32x128xf32>
    %76 = tpu.concatenate %70, %61, %75 in 0 : vector<32x128xf32>, vector<32x128xf32>, vector<32x128xf32> -> vector<96x128xf32>
    %cst_43 = arith.constant dense<0.000000e+00> : vector<32x128xf32>
    %77 = tpu.matmul %63, %76, %cst_43 {dimension_numbers = #tpu.dot_dimension_numbers<[1], [0], [0], [1], [0, 0, 1, 1], [], []>} : vector<32x96xf32>, vector<96x128xf32>, vector<32x128xf32> -> vector<32x128xf32>
    %78 = vector.broadcast %65 : vector<32x1xf32> to vector<32x128xf32>
    %79 = arith.addf %77, %78 : vector<32x128xf32>
    %cst_44 = arith.constant 0.000000e+00 : f32
    %80 = vector.broadcast %cst_44 : f32 to vector<32x128xf32>
    %81 = arith.cmpf ogt, %79, %80 : vector<32x128xf32>
    %cst_45 = arith.constant 1.000000e-01 : f32
    %82 = vector.broadcast %cst_45 : f32 to vector<32x128xf32>
    %83 = arith.mulf %82, %79 : vector<32x128xf32>
    %84 = arith.select %81, %79, %83 : vector<32x128xi1>, vector<32x128xf32>
    %85 = arith.mulf %84, %5 : vector<32x128xf32>
    %c1_46 = arith.constant 1 : index
    %c0_47 = arith.constant 0 : index
    %c0_48 = arith.constant 0 : index
    %86 = vector.load %arg5[%c1_46, %c0_47, %c0_48] : memref<3x32x96xf32, #tpu.memory_space<vmem>>, vector<1x32x96xf32>
    %87 = vector.shape_cast %86 : vector<1x32x96xf32> to vector<32x96xf32>
    %c1_49 = arith.constant 1 : index
    %c0_50 = arith.constant 0 : index
    %c0_51 = arith.constant 0 : index
    %88 = vector.load %arg6[%c1_49, %c0_50, %c0_51] : memref<3x32x1xf32, #tpu.memory_space<vmem>>, vector<1x32x1xf32>
    %89 = vector.shape_cast %88 : vector<1x32x1xf32> to vector<32x1xf32>
    %c1_i32_52 = arith.constant 1 : i32
    %90 = vector.broadcast %c1_i32_52 : i32 to vector<32x128xi32>
    %91 = arith.cmpi sge, %6, %90 : vector<32x128xi32>
    %c1_i32_53 = arith.constant 1 : i32
    %92 = tpu.dynamic_rotate %85 by %c1_i32_53 dim 1 : vector<32x128xf32>, i32 -> vector<32x128xf32>
    %cst_54 = arith.constant 0.000000e+00 : f32
    %93 = vector.broadcast %cst_54 : f32 to vector<32x128xf32>
    %94 = arith.select %91, %92, %93 : vector<32x128xi1>, vector<32x128xf32>
    %c127_i32_55 = arith.constant 127 : i32
    %95 = vector.broadcast %c127_i32_55 : i32 to vector<32x128xi32>
    %96 = arith.cmpi slt, %6, %95 : vector<32x128xi32>
    %c127_i32_56 = arith.constant 127 : i32
    %97 = tpu.dynamic_rotate %85 by %c127_i32_56 dim 1 : vector<32x128xf32>, i32 -> vector<32x128xf32>
    %cst_57 = arith.constant 0.000000e+00 : f32
    %98 = vector.broadcast %cst_57 : f32 to vector<32x128xf32>
    %99 = arith.select %96, %97, %98 : vector<32x128xi1>, vector<32x128xf32>
    %100 = tpu.concatenate %94, %85, %99 in 0 : vector<32x128xf32>, vector<32x128xf32>, vector<32x128xf32> -> vector<96x128xf32>
    %cst_58 = arith.constant dense<0.000000e+00> : vector<32x128xf32>
    %101 = tpu.matmul %87, %100, %cst_58 {dimension_numbers = #tpu.dot_dimension_numbers<[1], [0], [0], [1], [0, 0, 1, 1], [], []>} : vector<32x96xf32>, vector<96x128xf32>, vector<32x128xf32> -> vector<32x128xf32>
    %102 = vector.broadcast %89 : vector<32x1xf32> to vector<32x128xf32>
    %103 = arith.addf %101, %102 : vector<32x128xf32>
    %104 = arith.addf %103, %55 : vector<32x128xf32>
    %cst_59 = arith.constant 0.000000e+00 : f32
    %105 = vector.broadcast %cst_59 : f32 to vector<32x128xf32>
    %106 = arith.cmpf ogt, %104, %105 : vector<32x128xf32>
    %cst_60 = arith.constant 1.000000e-01 : f32
    %107 = vector.broadcast %cst_60 : f32 to vector<32x128xf32>
    %108 = arith.mulf %107, %104 : vector<32x128xf32>
    %109 = arith.select %106, %104, %108 : vector<32x128xi1>, vector<32x128xf32>
    %110 = arith.mulf %109, %5 : vector<32x128xf32>
    %c2 = arith.constant 2 : index
    %c0_61 = arith.constant 0 : index
    %c0_62 = arith.constant 0 : index
    %111 = vector.load %arg3[%c2, %c0_61, %c0_62] : memref<3x32x96xf32, #tpu.memory_space<vmem>>, vector<1x32x96xf32>
    %112 = vector.shape_cast %111 : vector<1x32x96xf32> to vector<32x96xf32>
    %c2_63 = arith.constant 2 : index
    %c0_64 = arith.constant 0 : index
    %c0_65 = arith.constant 0 : index
    %113 = vector.load %arg4[%c2_63, %c0_64, %c0_65] : memref<3x32x1xf32, #tpu.memory_space<vmem>>, vector<1x32x1xf32>
    %114 = vector.shape_cast %113 : vector<1x32x1xf32> to vector<32x1xf32>
    %c5_i32 = arith.constant 5 : i32
    %115 = vector.broadcast %c5_i32 : i32 to vector<32x128xi32>
    %116 = arith.cmpi sge, %6, %115 : vector<32x128xi32>
    %c5_i32_66 = arith.constant 5 : i32
    %117 = tpu.dynamic_rotate %110 by %c5_i32_66 dim 1 : vector<32x128xf32>, i32 -> vector<32x128xf32>
    %cst_67 = arith.constant 0.000000e+00 : f32
    %118 = vector.broadcast %cst_67 : f32 to vector<32x128xf32>
    %119 = arith.select %116, %117, %118 : vector<32x128xi1>, vector<32x128xf32>
    %c123_i32 = arith.constant 123 : i32
    %120 = vector.broadcast %c123_i32 : i32 to vector<32x128xi32>
    %121 = arith.cmpi slt, %6, %120 : vector<32x128xi32>
    %c123_i32_68 = arith.constant 123 : i32
    %122 = tpu.dynamic_rotate %110 by %c123_i32_68 dim 1 : vector<32x128xf32>, i32 -> vector<32x128xf32>
    %cst_69 = arith.constant 0.000000e+00 : f32
    %123 = vector.broadcast %cst_69 : f32 to vector<32x128xf32>
    %124 = arith.select %121, %122, %123 : vector<32x128xi1>, vector<32x128xf32>
    %125 = tpu.concatenate %119, %110, %124 in 0 : vector<32x128xf32>, vector<32x128xf32>, vector<32x128xf32> -> vector<96x128xf32>
    %cst_70 = arith.constant dense<0.000000e+00> : vector<32x128xf32>
    %126 = tpu.matmul %112, %125, %cst_70 {dimension_numbers = #tpu.dot_dimension_numbers<[1], [0], [0], [1], [0, 0, 1, 1], [], []>} : vector<32x96xf32>, vector<96x128xf32>, vector<32x128xf32> -> vector<32x128xf32>
    %127 = vector.broadcast %114 : vector<32x1xf32> to vector<32x128xf32>
    %128 = arith.addf %126, %127 : vector<32x128xf32>
    %cst_71 = arith.constant 0.000000e+00 : f32
    %129 = vector.broadcast %cst_71 : f32 to vector<32x128xf32>
    %130 = arith.cmpf ogt, %128, %129 : vector<32x128xf32>
    %cst_72 = arith.constant 1.000000e-01 : f32
    %131 = vector.broadcast %cst_72 : f32 to vector<32x128xf32>
    %132 = arith.mulf %131, %128 : vector<32x128xf32>
    %133 = arith.select %130, %128, %132 : vector<32x128xi1>, vector<32x128xf32>
    %134 = arith.mulf %133, %5 : vector<32x128xf32>
    %c2_73 = arith.constant 2 : index
    %c0_74 = arith.constant 0 : index
    %c0_75 = arith.constant 0 : index
    %135 = vector.load %arg5[%c2_73, %c0_74, %c0_75] : memref<3x32x96xf32, #tpu.memory_space<vmem>>, vector<1x32x96xf32>
    %136 = vector.shape_cast %135 : vector<1x32x96xf32> to vector<32x96xf32>
    %c2_76 = arith.constant 2 : index
    %c0_77 = arith.constant 0 : index
    %c0_78 = arith.constant 0 : index
    %137 = vector.load %arg6[%c2_76, %c0_77, %c0_78] : memref<3x32x1xf32, #tpu.memory_space<vmem>>, vector<1x32x1xf32>
    %138 = vector.shape_cast %137 : vector<1x32x1xf32> to vector<32x1xf32>
    %c1_i32_79 = arith.constant 1 : i32
    %139 = vector.broadcast %c1_i32_79 : i32 to vector<32x128xi32>
    %140 = arith.cmpi sge, %6, %139 : vector<32x128xi32>
    %c1_i32_80 = arith.constant 1 : i32
    %141 = tpu.dynamic_rotate %134 by %c1_i32_80 dim 1 : vector<32x128xf32>, i32 -> vector<32x128xf32>
    %cst_81 = arith.constant 0.000000e+00 : f32
    %142 = vector.broadcast %cst_81 : f32 to vector<32x128xf32>
    %143 = arith.select %140, %141, %142 : vector<32x128xi1>, vector<32x128xf32>
    %c127_i32_82 = arith.constant 127 : i32
    %144 = vector.broadcast %c127_i32_82 : i32 to vector<32x128xi32>
    %145 = arith.cmpi slt, %6, %144 : vector<32x128xi32>
    %c127_i32_83 = arith.constant 127 : i32
    %146 = tpu.dynamic_rotate %134 by %c127_i32_83 dim 1 : vector<32x128xf32>, i32 -> vector<32x128xf32>
    %cst_84 = arith.constant 0.000000e+00 : f32
    %147 = vector.broadcast %cst_84 : f32 to vector<32x128xf32>
    %148 = arith.select %145, %146, %147 : vector<32x128xi1>, vector<32x128xf32>
    %149 = tpu.concatenate %143, %134, %148 in 0 : vector<32x128xf32>, vector<32x128xf32>, vector<32x128xf32> -> vector<96x128xf32>
    %cst_85 = arith.constant dense<0.000000e+00> : vector<32x128xf32>
    %150 = tpu.matmul %136, %149, %cst_85 {dimension_numbers = #tpu.dot_dimension_numbers<[1], [0], [0], [1], [0, 0, 1, 1], [], []>} : vector<32x96xf32>, vector<96x128xf32>, vector<32x128xf32> -> vector<32x128xf32>
    %151 = vector.broadcast %138 : vector<32x1xf32> to vector<32x128xf32>
    %152 = arith.addf %150, %151 : vector<32x128xf32>
    %153 = arith.addf %152, %104 : vector<32x128xf32>
    %154 = arith.mulf %153, %5 : vector<32x128xf32>
    %c0_86 = arith.constant 0 : index
    %c0_87 = arith.constant 0 : index
    %c0_88 = arith.constant 0 : index
    %155 = vector.load %arg7[%c0_86, %c0_87, %c0_88] : memref<1x32x128xf32, #tpu.memory_space<vmem>>, vector<1x32x128xf32>
    %156 = vector.shape_cast %155 : vector<1x32x128xf32> to vector<32x128xf32>
    %157 = vector.shape_cast %154 : vector<32x128xf32> to vector<1x32x128xf32>
    tpu.vector_store %arg7[%c0_86, %c0_87, %c0_88], %157 {strides = array<i32>} : memref<1x32x128xf32, #tpu.memory_space<vmem>>, vector<1x32x128xf32>,
    return
  }
  func.func @transform_0(%arg0: i32) -> (i32, i32, i32) {
    %c0_i32 = arith.constant 0 : i32
    %c0_i32_0 = arith.constant 0 : i32
    %c0_i32_1 = arith.constant 0 : i32
    return %arg0, %c0_i32, %c0_i32_0 : i32, i32, i32
  }
  func.func @transform_1(%arg0: i32) -> (i32, i32, i32) {
    %c0_i32 = arith.constant 0 : i32
    %c0_i32_0 = arith.constant 0 : i32
    %c0_i32_1 = arith.constant 0 : i32
    return %arg0, %c0_i32, %c0_i32_0 : i32, i32, i32
  }
  func.func @transform_2(%arg0: i32) -> (i32, i32, i32) {
    %c0_i32 = arith.constant 0 : i32
    %c0_i32_0 = arith.constant 0 : i32
    %c0_i32_1 = arith.constant 0 : i32
    %c0_i32_2 = arith.constant 0 : i32
    return %c0_i32, %c0_i32_0, %c0_i32_1 : i32, i32, i32
  }
  func.func @transform_3(%arg0: i32) -> (i32, i32, i32) {
    %c0_i32 = arith.constant 0 : i32
    %c0_i32_0 = arith.constant 0 : i32
    %c0_i32_1 = arith.constant 0 : i32
    %c0_i32_2 = arith.constant 0 : i32
    return %c0_i32, %c0_i32_0, %c0_i32_1 : i32, i32, i32
  }
  func.func @transform_4(%arg0: i32) -> (i32, i32, i32) {
    %c0_i32 = arith.constant 0 : i32
    %c0_i32_0 = arith.constant 0 : i32
    %c0_i32_1 = arith.constant 0 : i32
    %c0_i32_2 = arith.constant 0 : i32
    return %c0_i32, %c0_i32_0, %c0_i32_1 : i32, i32, i32
  }
  func.func @transform_5(%arg0: i32) -> (i32, i32, i32) {
    %c0_i32 = arith.constant 0 : i32
    %c0_i32_0 = arith.constant 0 : i32
    %c0_i32_1 = arith.constant 0 : i32
    %c0_i32_2 = arith.constant 0 : i32
    return %c0_i32, %c0_i32_0, %c0_i32_1 : i32, i32, i32
  }
  func.func @transform_6(%arg0: i32) -> (i32, i32, i32) {
    %c0_i32 = arith.constant 0 : i32
    %c0_i32_0 = arith.constant 0 : i32
    %c0_i32_1 = arith.constant 0 : i32
    return %arg0, %c0_i32, %c0_i32_0 : i32, i32, i32
  }
}

</mosaic_0001>

<bundles_post_ra>
// kernel: tpu_custom_call.1
= control target key start
LH: loop header
LB: loop body
LE: loop exit
PB: predicated region body
PF: predicated region fallthrough
CT: control target
= control target key end

     0   :  { %11 = vsyncpa [#allocation3], 0  ;;  %s2870_s0 = inlined_call_operand.hbm [shape: f32[2,32,128], index: 0, kind: input, shape index: {}]   ;;  %s2871_s1 = inlined_call_operand.vmem [shape: f32[2,1,128], index: 1, kind: input, shape index: {}]   ;;  %s2872_s2 = inlined_call_operand.vmem [shape: f32[3,32,96], index: 2, kind: input, shape index: {}]   ;;  %s2873_s3 = inlined_call_operand.vmem [shape: f32[3,32,1], index: 3, kind: input, shape index: {}]   ;;  %s2874_s4 = inlined_call_operand.vmem [shape: f32[3,32,96], index: 4, kind: input, shape index: {}]   ;;  %s2875_s5 = inlined_call_operand.vmem [shape: f32[3,32,1], index: 5, kind: input, shape index: {}]   ;;  %s2876_s6 = inlined_call_operand.hbm [shape: f32[2,32,128], index: 6, kind: output, shape index: {}]  }
   0x1   :  { %13 = vsyncpa [#allocation3 + $0x1], 0 }
   0x2   :  { %14 = vsyncpa [#allocation4], 0 }
   0x3   :  { %16 = vsyncpa [#allocation4 + $0x1], 0  ;;  %s2333_s21 = smov 0   ;;  %s2335_s22 = smov 0  }
   0x4   :  { %s2337_s23 = smov 0   ;;  %s2339_s24 = smov 0  }
   0x5 LB: > { %s2354_s25 = sadd.s32 4294967295, %s2283_s24   ;;  %s1418_s26 = sadd.s32 4294967294, %s2283_s24   ;;  %s2283_s24 = sphi %s2339_s24, %s2895_s24   ;;  %s2279_s23 = sphi %s2337_s23, %s2894_s23   ;;  %s2275_s22 = sphi %s2335_s22, %s2893_s22   ;;  %s2271_s21 = sphi %s2333_s21, %s2892_s21  }
   0x6   : > { %s2358_s27 = sadd.s32 1, %s2283_s24   ;;  %s29_s28 = sadd.s32 1, %s2279_s23 }
   0x7   : > { %s26_s29 = ssub.s32 %s2283_s24, %s2358_s27  ;;  %p36_p0 = scmp.ne.s32.totalorder %s2279_s23, %s2275_s22 }
   0x8   : > { %p27_p1 = scmp.eq.s32.totalorder %s26_s29, 0  ;;  %p37_p2 = scmp.eq.s32.totalorder %s2283_s24, 0 }
   0x9   : > { %p42_p3 = scmp.ne.s32.totalorder %s2275_s22, %s2271_s21  ;;  %p43_p4 = scmp.eq.s32.totalorder %s2354_s25, 0 }
   0xa   : > { %s2370_s30 = scalar_select %p27_p1, %s2279_s23, %s29_s28  }
   0xb   : > { %p2372_p5 = por %p37_p2, %p36_p0  ;;  %p2376_p6 = por %p43_p4, %p42_p3 }
   0xc   : > { %p176_p7 = scmp.eq.s32.totalorder %s2354_s25, 1  ;;  %p182_p8 = scmp.eq.s32.totalorder %s1418_s26, 1 }
   0xd   : > { %p2019_p10 = scmp.lt.s32.totalorder %s2283_s24, 2  ;;  %s214_s11 = sand.u32 1, %s2279_s23  }
   0xe   : > { %p2383_p11 = por %p176_p7, %p36_p0  ;;  %p2387_p12 = por %p182_p8, %p42_p3 }
   0xf   : > { %s1537_s12 = sshll.u32 %s2283_s24, 9  ;;  %s1421_s13 = sshll.u32 %s214_s11, 5 }
  0x10   : > { %s2881_s9 = scalar_select %p2383_p11, 1, 0 }
  0x11   : > { %s2882_s10 = scalar_select %p2387_p12, 1, 0 }
  0x12   : > { %s2396_s16 = scalar_lea.hbm %s2870_s0, %s1537_s12  ;;  %s218_s17 = scalar_lea.vmem [#allocation2], %s1421_s13 }
  0x13   : > { %s225_s18 = sshll.u32 %s218_s17, 4  ;;  %p2400_p13 = pnand %p2019_p10, %p2372_p5  ;;  %s2404_s18 = int_to_ptr.vmem [resolvable:$true] %s225_s18 }
  0x14   : > { %s2406_s20 = scalar_lea.sflag [#allocation3], %s214_s11  ;;  %s2187_s26 = scalar_lea.hbm %s2396_s16, 512 }
  0x15   : > { %p2188_p0 = scmp.ne.s32.totalorder %s2396_s16, %s2187_s26  ;;  %p2189_p1 = pneg %p2400_p13 }
  0x16   : > { %s2192_s7 = scalar_lea.hbm %s2870_s0, 1024  ;;  %p2193_p4 = scmp.lt.u32.totalorder %s2396_s16, %s2870_s0 }
  0x17   : > { %p2190_p2 = pnand %p2189_p1, %p2188_p0  ;;  %p2194_p5 = scmp.lt.u32.totalorder %s2192_s7, %s2187_s26 }
  0x18   : > { %p2196_p8 = scmp.lt.u32.totalorder %s2187_s26, %s2396_s16 }
  0x19   : > { %p2191_p3 = pneg %p2190_p2  ;;  %p2195_p7 = por %p2194_p5, %p2193_p4 }
  0x1b   : > { %p2197_p10 = por %p2196_p8, %p2195_p7 }
  0x1d   : > { %p2198_p9 = pnand %p2197_p10, %p2191_p3 }
  0x1f   : > { %2201 = shalt.err (!%p2198_p9)
}
  0x20   : > { %s2202_s11 = scalar_lea.vmem %s2404_s18, 512  ;;  %s2285_s14 = smov [#allocation2]  }
  0x21   : > { %p2203_p0 = scmp.ne.s32.totalorder %s2404_s18, %s2202_s11  ;;  %s2207_s15 = sshll.u32 %s2285_s14, 4  ;;  %s2208_s15 = int_to_ptr.vmem [resolvable:$false] %s2207_s15 }
  0x22   : > { %s2209_s17 = scalar_lea.vmem %s2208_s15, 1024  ;;  %p2210_p11 = scmp.lt.s32.totalorder %s2404_s18, %s2208_s15 }
  0x23   : > { %p2205_p2 = pnand %p2203_p0, %p2189_p1  ;;  %p2211_p4 = scmp.lt.s32.totalorder %s2209_s17, %s2202_s11 }
  0x25   : > { %p2206_p12 = pneg %p2205_p2  ;;  %p2212_p5 = por %p2211_p4, %p2210_p11 }
  0x27   : > { %p2213_p7 = pnand %p2212_p5, %p2206_p12 }
  0x29   : > { %2216 = shalt.err (!%p2213_p7)
}
  0x2a   : > { %s2286_s26 = smov 128   ;;  %s2287_s28 = smov 8  }
  0x2b   : > { %2014 = dma.hbm_to_vmem [thread:$0]  (!%p2400_p13), %s2396_s16, 512, %s2404_s18, %s2406_s20, %s2286_s26, %s2286_s26, %s2287_s28  }
  0x2c   : > { %p1424_p9 = scmp.ge.s32.totalorder %s2283_s24, 1  ;;  %p239_p1 = scmp.lt.s32.totalorder %s2283_s24, 3 }
  0x2e   : > { %p240_p3 = pnand %p1424_p9, %p239_p1 }
  0x2f   : > { %s2437_s29 = sand.u32 (!%p240_p3), 1, %s2275_s22  }
  0x30   : > { %243 = sbr.rel (%p240_p3) target bundleno = 2276 (0x8e4), region = 44  ;;  %s2878_s7 = sshll.u32 (!%p240_p3), %s2437_s29, 5 }
  0x31   : > { %s246_s12 = scalar_lea.sflag (!%p240_p3), [#allocation3], %s2437_s29  ;;  %s249_s13 = scalar_lea.vmem (!%p240_p3), [#allocation2], %s2878_s7 }
  0x37   : > { %2262 = dma.done.wait (%p2376_p6), %s246_s12, 512  }
  0x38   : > { %2264 = vsyncadd (%p2376_p6), %s246_s12, 4294966784  ;;  %p281_p11 = scmp.lt.s32.totalorder %s2354_s25, 1  ;;  %v2454_v0 = vld [vmem:[%s249_s13] sm:$0xff]  ;;  %v2456_v1 = vld [vmem:[%s249_s13 + $0x8] sm:$0xff]  ;;  %s2288_s8 = smov 1   ;;  %vm367_vm4 = vcmask 785408   ;;  %v295_v27 = vlaneseq }
  0x39   : > { %vm297_vm0 = vcmp.gt.f32.partialorder %v2454_v0, 0.0  ;;  %vm298_vm1 = vcmp.gt.f32.partialorder %v2456_v1, 0.0  ;;  %v301_v3 = vmul.f32 0.1, %v2454_v0  ;;  %v302_v4 = vmul.f32 0.1, %v2456_v1 }
  0x3a   : > { %s282_s16 = scalar_select %p281_p11, %s2354_s25, 1  ;;  %v2465_v5 = vld [vmem:[%s249_s13 + $0x10] sm:$0xff]  ;;  %v2467_v6 = vld [vmem:[%s249_s13 + $0x18] sm:$0xff]  ;;  %v313_v21 = vld [vmem:[%s2872_s2] sm:$0xff]  ;;  %v2290_v24 = vmov 0   ;;  %v2501_v28 = vand.u32 127, %v295_v27 }
  0x3b   : > { %v305_v7 = vsel %vm297_vm0, %v2454_v0, %v301_v3  ;;  %v306_v8 = vsel %vm298_vm1, %v2456_v1, %v302_v4  ;;  %vm299_vm2 = vcmp.gt.f32.partialorder %v2465_v5, 0.0  ;;  %vm300_vm3 = vcmp.gt.f32.partialorder %v2467_v6, 0.0  ;;  %s2289_s11 = smov 127   ;;  %1659 = vmatprep.mubr.msk.f32.mxu0 %vm367_vm4, %v313_v21  ;;  %v318_v22 = vld [vmem:[%s2873_s3 + $0x8] sm:$0xff]  ;;  %v317_v23 = vld [vmem:[%s2873_s3] sm:$0xff]  ;;  %2085 = vset.pattern.permute.xlu1 %v2290_v24  ;;  %v319_v25 = vld [vmem:[%s2873_s3 + $0x10] sm:$0xff] }
  0x3c   : > { %s2452_s20 = scalar_lea.vmem %s2871_s1, %s282_s16  ;;  %v303_v11 = vmul.f32 0.1, %v2465_v5  ;;  %v304_v12 = vmul.f32 0.1, %v2467_v6  ;;  %2084 = vset.pattern.permute.xlu0 %v2290_v24  ;;  %v320_v26 = vld [vmem:[%s2873_s3 + $0x18] sm:$0xff]  ;;  %vm321_vm5 = vcmp.ge.s32.totalorder %v2501_v28, 1 }
  0x3d   : > { %v2459_v2 = vld [vmem:[%s2452_s20] ss:$0 sm:$0xff]  ;;  %vm2504_vm6 = vmpackc.low %vm321_vm5, %vm321_vm5  ;;  %vm334_vm7 = vcmp.lt.s32.totalorder %v2501_v28, 127  ;;  %v314_v47 = vld [vmem:[%s2872_s2 + $0x8] sm:$0xff]  ;;  %s2291_s17 = smov 3   ;;  %s2292_s26 = smov 125  }
  0x3e   : > { %v309_v9 = vmul.f32 %v2459_v2, %v305_v7  ;;  %v310_v10 = vmul.f32 %v2459_v2, %v306_v8  ;;  %v307_v14 = vsel %vm299_vm2, %v2465_v5, %v303_v11  ;;  %v308_v15 = vsel %vm300_vm3, %v2467_v6, %v304_v12  ;;  %vm2517_vm8 = vmpackc.low %vm334_vm7, %vm334_vm7  ;;  %v315_v48 = vld [vmem:[%s2872_s2 + $0x10] sm:$0xff]  ;;  %v316_v49 = vld [vmem:[%s2872_s2 + $0x18] sm:$0xff]  ;;  %s2293_s7 = smov 5   ;;  %p2889_p12 = scmp.ne.s32.totalorder %s2881_s9, 0 }
  0x3f   : > { %v311_v16 = vmul.f32 %v2459_v2, %v307_v14  ;;  %v312_v17 = vmul.f32 %v2459_v2, %v308_v15  ;;  %v487_v21 = vld [vmem:[%s2875_s5 + $0x10] sm:$0xff]  ;;  %vm660_vm1 = vcmp.ge.s32.totalorder %v2501_v28, 3  ;;  %vm673_vm3 = vcmp.lt.s32.totalorder %v2501_v28, 125  ;;  %v1513_v32 = vld [vmem:[%s2874_s4 + $0x48] sm:$0xff] }
  0x40   : > { %v2064_v13 = vpack.i.bf16 %v310_v10, %v309_v9  ;;  %v1827_v18 = vpack.c.bf16 %v310_v10, %v309_v9  ;;  %vm1880_vm2 = vmpackc.low %vm660_vm1, %vm660_vm1 }
  0x41   : > { %v2069_v19 = vpack.i.bf16 %v312_v17, %v311_v16  ;;  %v1831_v20 = vpack.c.bf16 %v312_v17, %v311_v16  ;;  %vm1900_vm5 = vmpackc.low %vm673_vm3, %vm673_vm3 }
  0x42   : > { %2065 = vrot.lane.b32.xlu0 %v2064_v13, %s2288_s8  ;;  %2075 = vrot.lane.b32.xlu1 %v2064_v13, %s2289_s11 }
  0x46   : > { %2070 = vrot.lane.b32.xlu0 %v2069_v19, %s2288_s8  ;;  %2080 = vrot.lane.b32.xlu1 %v2069_v19, %s2289_s11  ;;  %v485_v19 = vld [vmem:[%s2875_s5] sm:$0xff] }
  0x4a   : > { %354 = vperm.xlu1 %2085, %v318_v22   ;;  %349 = vperm.xlu0 %2084, %v317_v23   ;;  %v481_v22 = vld [vmem:[%s2874_s4] sm:$0xff]  ;;  %v488_v23 = vld [vmem:[%s2875_s5 + $0x18] sm:$0xff] }
  0x4b   : > { %1689 = vmatprep.mubr.msk.f32.mxu1 %vm367_vm4, %v481_v22 }
  0x4e   : > { %359 = vperm.xlu1 %2085, %v319_v25   ;;  %364 = vperm.xlu0 %2084, %v320_v26  }
  0xb4   : > { %v2066_v29 = vpop.permute.xlu0 %2065  ;;  %v2076_v37 = vpop.permute.xlu1 %2075 }
  0xb5   : > { %v2068_v30 = vunpack.i.h.bf16 %v2066_v29  ;;  %v2067_v31 = vunpack.i.l.bf16 %v2066_v29  ;;  %v2078_v39 = vunpack.i.h.bf16 %v2076_v37  ;;  %v2077_v40 = vunpack.i.l.bf16 %v2076_v37 }
  0xb7   : > { %v1815_v33 = vpack.c.bf16 %v2068_v30, %v2067_v31  ;;  %v1835_v42 = vpack.c.bf16 %v2078_v39, %v2077_v40 }
  0xb8   : > { %v2071_v34 = vpop.permute.xlu0 %2070  ;;  %v2081_v41 = vpop.permute.xlu1 %2080 }
  0xb9   : > { %v2073_v35 = vunpack.i.h.bf16 %v2071_v34  ;;  %v2072_v36 = vunpack.i.l.bf16 %v2071_v34  ;;  %1817 = vmatprep.subr.msk.bf16.mxu0 %vm2504_vm6, %v1815_v33  ;;  %v2083_v43 = vunpack.i.h.bf16 %v2081_v41  ;;  %v2082_v44 = vunpack.i.l.bf16 %v2081_v41 }
  0xba   : > { %1820 = vmatpush3.bf16.msk.msra.mxu0 %vm2504_vm6, %v1815_v33 }
  0xbb   : > { %v1821_v38 = vpack.c.bf16 %v2073_v35, %v2072_v36  ;;  %v1841_v46 = vpack.c.bf16 %v2083_v43, %v2082_v44  ;;  %v483_v43 = vld [vmem:[%s2874_s4 + $0x10] sm:$0xff]  ;;  %v484_v44 = vld [vmem:[%s2874_s4 + $0x18] sm:$0xff] }
  0xbd   : > { %1823 = vmatprep.subr.msk.bf16.mxu0 %vm2504_vm6, %v1821_v38 }
  0xbe   : > { %1826 = vmatpush3.bf16.msk.msra.mxu0 %vm2504_vm6, %v1821_v38 }
  0xbf   : > { %1828 = vmatprep.subr.bf16.mxu0 %v1827_v18 }
  0xc2   : > { %1830 = vmatpush3.bf16.msra.mxu0 %v1827_v18 }
  0xc3   : > { %1832 = vmatprep.subr.bf16.mxu0 %v1831_v20 }
  0xc6   : > { %1834 = vmatpush3.bf16.msra.mxu0 %v1831_v20  ;;  %v486_v20 = vld [vmem:[%s2875_s5 + $0x8] sm:$0xff] }
  0xc7   : > { %1837 = vmatprep.subr.msk.bf16.mxu0 %vm2517_vm8, %v1835_v42 }
  0xc9   : > { %v350_v50 = vpop.permute.xlu0 %349  ;;  %v355_v51 = vpop.permute.xlu1 %354 }
  0xca   : > { %1840 = vmatpush3.bf16.msk.msra.mxu0 %vm2517_vm8, %v1835_v42  ;;  %v482_v42 = vld [vmem:[%s2874_s4 + $0x8] sm:$0xff] }
  0xcb   : > { %1843 = vmatprep.subr.msk.bf16.mxu0 %vm2517_vm8, %v1841_v46 }
  0xcd   : > { %v365_v57 = vpop.permute.xlu0 %364  ;;  %v360_v61 = vpop.permute.xlu1 %359 }
  0xce   : > { %1846 = vmatpush3.bf16.msk.msra.mxu0 %vm2517_vm8, %v1841_v46 }
  0xd1   : > { %1660 = vmatmul.mubr.msk.f32.vlgmr.msra.gmra.mrb[0].mxu0 %vm367_vm4, %v314_v47 }
  0xd2   : > { %1662 = vmatprep.mubr.msk.f32.mxu0 %vm367_vm4, %v315_v48 }
  0xd5   : > { %1663 = vmatmul.mubr.msk.f32.gmra.mrb[2].mxu0 %vm367_vm4, %v316_v49 }
 0x1a4   : > { %v1661_v52 = vpop.f32.mrb[0].mxu0 }
 0x1a5   : > { %v452_v53 = vadd.f32 %v1661_v52, %v355_v51  ;;  %v446_v54 = vpop.f32.mrb[1].mxu0 }
 0x1a6   : > { %v447_v55 = vadd.f32 %v446_v54, %v350_v50 }
 0x1a7   : > { %vm466_vm9 = vcmp.gt.f32.partialorder %v452_v53, 0.0  ;;  %v470_v56 = vmul.f32 0.1, %v452_v53 }
 0x1a8   : > { %vm465_vm10 = vcmp.gt.f32.partialorder %v447_v55, 0.0  ;;  %v469_v58 = vmul.f32 0.1, %v447_v55  ;;  %v1664_v59 = vpop.f32.mrb[2].mxu0 }
 0x1a9   : > { %v474_v60 = vsel %vm466_vm9, %v452_v53, %v470_v56  ;;  %v462_v62 = vadd.f32 %v1664_v59, %v365_v57  ;;  %v456_v63 = vpop.f32.mrb[3].mxu0 }
 0x1aa   : > { %v478_v3 = vmul.f32 %v2459_v2, %v474_v60  ;;  %v473_v4 = vsel %vm465_vm10, %v447_v55, %v469_v58  ;;  %v457_v7 = vadd.f32 %v456_v63, %v360_v61 }
 0x1ab   : > { %v477_v8 = vmul.f32 %v2459_v2, %v473_v4  ;;  %vm468_vm11 = vcmp.gt.f32.partialorder %v462_v62, 0.0  ;;  %v472_v9 = vmul.f32 0.1, %v462_v62 }
 0x1ac   : > { %vm467_vm12 = vcmp.gt.f32.partialorder %v457_v7, 0.0  ;;  %v471_v10 = vmul.f32 0.1, %v457_v7 }
 0x1ad   : > { %v476_v11 = vsel %vm468_vm11, %v462_v62, %v472_v9  ;;  %v2086_v12 = vpack.i.bf16 %v478_v3, %v477_v8  ;;  %v1859_v13 = vpack.c.bf16 %v478_v3, %v477_v8 }
 0x1ae   : > { %v480_v14 = vmul.f32 %v2459_v2, %v476_v11  ;;  %v475_v15 = vsel %vm467_vm12, %v457_v7, %v471_v10 }
 0x1af   : > { %v479_v16 = vmul.f32 %v2459_v2, %v475_v15  ;;  %2087 = vrot.lane.b32.xlu1 %v2086_v12, %s2288_s8  ;;  %v1456_v15 = vld [vmem:[%s2873_s3 + $0x20] sm:$0xff] }
 0x1b1   : > { %v2091_v17 = vpack.i.bf16 %v480_v14, %v479_v16  ;;  %v1863_v18 = vpack.c.bf16 %v480_v14, %v479_v16  ;;  %v1457_v16 = vld [vmem:[%s2873_s3 + $0x28] sm:$0xff] }
 0x1b3   : > { %2092 = vrot.lane.b32.xlu0 %v2091_v17, %s2288_s8  ;;  %2097 = vrot.lane.b32.xlu1 %v2086_v12, %s2289_s11 }
 0x1b7   : > { %2102 = vrot.lane.b32.xlu0 %v2091_v17, %s2289_s11  ;;  %515 = vperm.xlu1 %2085, %v485_v19   ;;  %v1458_v17 = vld [vmem:[%s2873_s3 + $0x30] sm:$0xff]  ;;  %v1459_v19 = vld [vmem:[%s2873_s3 + $0x38] sm:$0xff] }
 0x1bb   : > { %520 = vperm.xlu0 %2084, %v486_v20   ;;  %525 = vperm.xlu1 %2085, %v487_v21  }
 0x1bf   : > { %530 = vperm.xlu0 %2084, %v488_v23  }
 0x221   : > { %v2088_v24 = vpop.permute.xlu1 %2087 }
 0x222   : > { %v2090_v25 = vunpack.i.h.bf16 %v2088_v24  ;;  %v2089_v26 = vunpack.i.l.bf16 %v2088_v24 }
 0x224   : > { %v1847_v27 = vpack.c.bf16 %v2090_v25, %v2089_v26 }
 0x225   : > { %v2093_v29 = vpop.permute.xlu0 %2092  ;;  %v2098_v34 = vpop.permute.xlu1 %2097 }
 0x226   : > { %v2095_v30 = vunpack.i.h.bf16 %v2093_v29  ;;  %v2094_v31 = vunpack.i.l.bf16 %v2093_v29  ;;  %1849 = vmatprep.subr.msk.bf16.mxu1 %vm2504_vm6, %v1847_v27  ;;  %v2100_v35 = vunpack.i.h.bf16 %v2098_v34  ;;  %v2099_v36 = vunpack.i.l.bf16 %v2098_v34 }
 0x227   : > { %1852 = vmatpush3.bf16.msk.msra.mxu1 %vm2504_vm6, %v1847_v27 }
 0x228   : > { %v1853_v33 = vpack.c.bf16 %v2095_v30, %v2094_v31  ;;  %v1867_v38 = vpack.c.bf16 %v2100_v35, %v2099_v36 }
 0x229   : > { %v2103_v37 = vpop.permute.xlu0 %2102 }
 0x22a   : > { %1855 = vmatprep.subr.msk.bf16.mxu1 %vm2504_vm6, %v1853_v33  ;;  %v2105_v39 = vunpack.i.h.bf16 %v2103_v37  ;;  %v2104_v40 = vunpack.i.l.bf16 %v2103_v37 }
 0x22b   : > { %1858 = vmatpush3.bf16.msk.msra.mxu1 %vm2504_vm6, %v1853_v33 }
 0x22c   : > { %1860 = vmatprep.subr.bf16.mxu1 %v1859_v13  ;;  %v1873_v41 = vpack.c.bf16 %v2105_v39, %v2104_v40  ;;  %v1454_v39 = vld [vmem:[%s2872_s2 + $0x30] sm:$0xff]  ;;  %v1455_v40 = vld [vmem:[%s2872_s2 + $0x38] sm:$0xff] }
 0x22f   : > { %1862 = vmatpush3.bf16.msra.mxu1 %v1859_v13 }
 0x230   : > { %1864 = vmatprep.subr.bf16.mxu1 %v1863_v18 }
 0x233   : > { %1866 = vmatpush3.bf16.msra.mxu1 %v1863_v18  ;;  %v1452_v18 = vld [vmem:[%s2872_s2 + $0x20] sm:$0xff] }
 0x234   : > { %1869 = vmatprep.subr.msk.bf16.mxu1 %vm2517_vm8, %v1867_v38  ;;  %1719 = vmatprep.mubr.msk.f32.mxu0 %vm367_vm4, %v1452_v18 }
 0x236   : > { %v516_v47 = vpop.permute.xlu1 %515 }
 0x237   : > { %1872 = vmatpush3.bf16.msk.msra.mxu1 %vm2517_vm8, %v1867_v38  ;;  %v1453_v38 = vld [vmem:[%s2872_s2 + $0x28] sm:$0xff] }
 0x238   : > { %1875 = vmatprep.subr.msk.bf16.mxu1 %vm2517_vm8, %v1873_v41 }
 0x23a   : > { %v521_v46 = vpop.permute.xlu0 %520  ;;  %v526_v56 = vpop.permute.xlu1 %525 }
 0x23b   : > { %1878 = vmatpush3.bf16.msk.msra.mxu1 %vm2517_vm8, %v1873_v41 }
 0x23e   : > { %1690 = vmatmul.mubr.msk.f32.vlgmr.msra.gmra.mrb[0].mxu1 %vm367_vm4, %v482_v42  ;;  %v531_v53 = vpop.permute.xlu0 %530 }
 0x23f   : > { %1692 = vmatprep.mubr.msk.f32.mxu1 %vm367_vm4, %v483_v43 }
 0x242   : > { %1693 = vmatmul.mubr.msk.f32.gmra.mrb[2].mxu1 %vm367_vm4, %v484_v44 }
 0x311   : > { %v1691_v48 = vpop.f32.mrb[0].mxu1 }
 0x312   : > { %v617_v49 = vadd.f32 %v1691_v48, %v521_v46  ;;  %v611_v50 = vpop.f32.mrb[1].mxu1 }
 0x313   : > { %v612_v51 = vadd.f32 %v611_v50, %v516_v47 }
 0x314   : > { %v2594_v52 = vadd.f32 %v617_v49, %v2456_v1 }
 0x315   : > { %v2597_v54 = vadd.f32 %v612_v51, %v2454_v0  ;;  %v1694_v55 = vpop.f32.mrb[2].mxu1 }
 0x316   : > { %vm635_vm13 = vcmp.gt.f32.partialorder %v2594_v52, 0.0  ;;  %v639_v57 = vmul.f32 0.1, %v2594_v52  ;;  %v627_v58 = vadd.f32 %v1694_v55, %v531_v53  ;;  %v621_v59 = vpop.f32.mrb[3].mxu1 }
 0x317   : > { %vm634_vm14 = vcmp.gt.f32.partialorder %v2597_v54, 0.0  ;;  %v638_v60 = vmul.f32 0.1, %v2597_v54  ;;  %v622_v61 = vadd.f32 %v621_v59, %v526_v56 }
 0x318   : > { %v2604_v1 = vadd.f32 %v627_v58, %v2467_v6  ;;  %v643_v62 = vsel %vm635_vm13, %v2594_v52, %v639_v57 }
 0x319   : > { %v2608_v0 = vadd.f32 %v622_v61, %v2465_v5  ;;  %v642_v63 = vsel %vm634_vm14, %v2597_v54, %v638_v60  ;;  %v647_v3 = vmul.f32 %v2459_v2, %v643_v62 }
 0x31a   : > { %vm637_vm15 = vcmp.gt.f32.partialorder %v2604_v1, 0.0  ;;  %v641_v4 = vmul.f32 0.1, %v2604_v1  ;;  %v646_v7 = vmul.f32 %v2459_v2, %v642_v63 }
 0x31b   : > { %vm636_vm0 = vcmp.gt.f32.partialorder %v2608_v0, 0.0  ;;  %v640_v6 = vmul.f32 0.1, %v2608_v0 }
 0x31c   : > { %v2106_v8 = vpack.i.bf16 %v647_v3, %v646_v7  ;;  %v645_v9 = vsel %vm637_vm15, %v2604_v1, %v641_v4  ;;  %v1891_v10 = vpack.c.bf16 %v647_v3, %v646_v7 }
 0x31d   : > { %v644_v5 = vsel %vm636_vm0, %v2608_v0, %v640_v6  ;;  %v649_v11 = vmul.f32 %v2459_v2, %v645_v9  ;;  %vm1000_vm0 = vcmp.ge.s32.totalorder %v2501_v28, 5 }
 0x31e   : > { %2107 = vrot.lane.b32.xlu1 %v2106_v8, %s2291_s17  ;;  %v648_v12 = vmul.f32 %v2459_v2, %v644_v5  ;;  %vm1944_vm1 = vmpackc.low %vm1000_vm0, %vm1000_vm0 }
 0x320   : > { %v2111_v13 = vpack.i.bf16 %v649_v11, %v648_v12  ;;  %v1895_v14 = vpack.c.bf16 %v649_v11, %v648_v12  ;;  %v1476_v11 = vld [vmem:[%s2875_s5 + $0x20] sm:$0xff]  ;;  %v1477_v12 = vld [vmem:[%s2875_s5 + $0x28] sm:$0xff] }
 0x322   : > { %2112 = vrot.lane.b32.xlu0 %v2111_v13, %s2291_s17  ;;  %2117 = vrot.lane.b32.xlu1 %v2106_v8, %s2292_s26  ;;  %s2888_s17 = sshll.u32 %s2437_s29, 5 }
 0x326   : > { %2122 = vrot.lane.b32.xlu0 %v2111_v13, %s2292_s26  ;;  %688 = vperm.xlu1 %2085, %v1456_v15   ;;  %v1478_v13 = vld [vmem:[%s2875_s5 + $0x30] sm:$0xff]  ;;  %v1479_v15 = vld [vmem:[%s2875_s5 + $0x38] sm:$0xff]  ;;  %s2294_s26 = smov 123  }
 0x32a   : > { %693 = vperm.xlu0 %2084, %v1457_v16   ;;  %698 = vperm.xlu1 %2085, %v1458_v17  }
 0x32e   : > { %703 = vperm.xlu0 %2084, %v1459_v19  }
 0x390   : > { %v2108_v20 = vpop.permute.xlu1 %2107 }
 0x391   : > { %v2110_v21 = vunpack.i.h.bf16 %v2108_v20  ;;  %v2109_v22 = vunpack.i.l.bf16 %v2108_v20 }
 0x393   : > { %v1879_v23 = vpack.c.bf16 %v2110_v21, %v2109_v22 }
 0x394   : > { %v2113_v24 = vpop.permute.xlu0 %2112  ;;  %v2118_v29 = vpop.permute.xlu1 %2117 }
 0x395   : > { %v2115_v25 = vunpack.i.h.bf16 %v2113_v24  ;;  %v2114_v26 = vunpack.i.l.bf16 %v2113_v24  ;;  %1881 = vmatprep.subr.msk.bf16.mxu0 %vm1880_vm2, %v1879_v23  ;;  %v2120_v30 = vunpack.i.h.bf16 %v2118_v29  ;;  %v2119_v31 = vunpack.i.l.bf16 %v2118_v29 }
 0x396   : > { %1884 = vmatpush3.bf16.msk.msra.mxu0 %vm1880_vm2, %v1879_v23 }
 0x397   : > { %v1885_v27 = vpack.c.bf16 %v2115_v25, %v2114_v26  ;;  %v1899_v34 = vpack.c.bf16 %v2120_v30, %v2119_v31 }
 0x398   : > { %v2123_v33 = vpop.permute.xlu0 %2122 }
 0x399   : > { %1887 = vmatprep.subr.msk.bf16.mxu0 %vm1880_vm2, %v1885_v27  ;;  %v2125_v35 = vunpack.i.h.bf16 %v2123_v33  ;;  %v2124_v36 = vunpack.i.l.bf16 %v2123_v33 }
 0x39a   : > { %1890 = vmatpush3.bf16.msk.msra.mxu0 %vm1880_vm2, %v1885_v27  ;;  %vm1013_vm2 = vcmp.lt.s32.totalorder %v2501_v28, 123  ;;  %v1494_v28 = vld [vmem:[%s2872_s2 + $0x50] sm:$0xff] }
 0x39b   : > { %1892 = vmatprep.subr.bf16.mxu0 %v1891_v10  ;;  %v1905_v37 = vpack.c.bf16 %v2125_v35, %v2124_v36  ;;  %v1474_v35 = vld [vmem:[%s2874_s4 + $0x30] sm:$0xff]  ;;  %v1475_v36 = vld [vmem:[%s2874_s4 + $0x38] sm:$0xff]  ;;  %vm1964_vm3 = vmpackc.low %vm1013_vm2, %vm1013_vm2 }
 0x39e   : > { %1894 = vmatpush3.bf16.msra.mxu0 %v1891_v10 }
 0x39f   : > { %1896 = vmatprep.subr.bf16.mxu0 %v1895_v14 }
 0x3a2   : > { %1898 = vmatpush3.bf16.msra.mxu0 %v1895_v14  ;;  %v1472_v14 = vld [vmem:[%s2874_s4 + $0x20] sm:$0xff] }
 0x3a3   : > { %1901 = vmatprep.subr.msk.bf16.mxu0 %vm1900_vm5, %v1899_v34  ;;  %1749 = vmatprep.mubr.msk.f32.mxu1 %vm367_vm4, %v1472_v14 }
 0x3a5   : > { %v689_v42 = vpop.permute.xlu1 %688 }
 0x3a6   : > { %1904 = vmatpush3.bf16.msk.msra.mxu0 %vm1900_vm5, %v1899_v34  ;;  %v1473_v34 = vld [vmem:[%s2874_s4 + $0x28] sm:$0xff] }
 0x3a7   : > { %1907 = vmatprep.subr.msk.bf16.mxu0 %vm1900_vm5, %v1905_v37 }
 0x3a9   : > { %v694_v41 = vpop.permute.xlu0 %693  ;;  %v699_v53 = vpop.permute.xlu1 %698 }
 0x3aa   : > { %1910 = vmatpush3.bf16.msk.msra.mxu0 %vm1900_vm5, %v1905_v37 }
 0x3ad   : > { %1720 = vmatmul.mubr.msk.f32.vlgmr.msra.gmra.mrb[4].mxu0 %vm367_vm4, %v1453_v38  ;;  %v704_v49 = vpop.permute.xlu0 %703 }
 0x3ae   : > { %1722 = vmatprep.mubr.msk.f32.mxu0 %vm367_vm4, %v1454_v39 }
 0x3b1   : > { %1723 = vmatmul.mubr.msk.f32.gmra.mrb[6].mxu0 %vm367_vm4, %v1455_v40 }
 0x480   : > { %v1721_v43 = vpop.f32.mrb[4].mxu0 }
 0x481   : > { %v790_v44 = vadd.f32 %v1721_v43, %v694_v41  ;;  %v784_v46 = vpop.f32.mrb[5].mxu0 }
 0x482   : > { %v785_v47 = vadd.f32 %v784_v46, %v689_v42 }
 0x483   : > { %vm804_vm7 = vcmp.gt.f32.partialorder %v790_v44, 0.0  ;;  %v808_v48 = vmul.f32 0.1, %v790_v44 }
 0x484   : > { %vm803_vm9 = vcmp.gt.f32.partialorder %v785_v47, 0.0  ;;  %v807_v50 = vmul.f32 0.1, %v785_v47  ;;  %v1724_v51 = vpop.f32.mrb[6].mxu0 }
 0x485   : > { %v812_v55 = vsel %vm804_vm7, %v790_v44, %v808_v48  ;;  %v800_v56 = vadd.f32 %v1724_v51, %v704_v49  ;;  %v794_v57 = vpop.f32.mrb[7].mxu0 }
 0x486   : > { %v816_v58 = vmul.f32 %v2459_v2, %v812_v55  ;;  %v811_v59 = vsel %vm803_vm9, %v785_v47, %v807_v50  ;;  %v795_v60 = vadd.f32 %v794_v57, %v699_v53 }
 0x487   : > { %v815_v61 = vmul.f32 %v2459_v2, %v811_v59  ;;  %vm806_vm10 = vcmp.gt.f32.partialorder %v800_v56, 0.0  ;;  %v810_v62 = vmul.f32 0.1, %v800_v56 }
 0x488   : > { %vm805_vm11 = vcmp.gt.f32.partialorder %v795_v60, 0.0  ;;  %v809_v63 = vmul.f32 0.1, %v795_v60 }
 0x489   : > { %v814_v3 = vsel %vm806_vm10, %v800_v56, %v810_v62  ;;  %v2126_v4 = vpack.i.bf16 %v816_v58, %v815_v61  ;;  %v1923_v7 = vpack.c.bf16 %v816_v58, %v815_v61 }
 0x48a   : > { %v818_v6 = vmul.f32 %v2459_v2, %v814_v3  ;;  %v813_v8 = vsel %vm805_vm11, %v795_v60, %v809_v63 }
 0x48b   : > { %v817_v9 = vmul.f32 %v2459_v2, %v813_v8  ;;  %2127 = vrot.lane.b32.xlu1 %v2126_v4, %s2288_s8  ;;  %v1496_v8 = vld [vmem:[%s2873_s3 + $0x40] sm:$0xff] }
 0x48d   : > { %v2131_v10 = vpack.i.bf16 %v818_v6, %v817_v9  ;;  %v1927_v5 = vpack.c.bf16 %v818_v6, %v817_v9  ;;  %v1497_v9 = vld [vmem:[%s2873_s3 + $0x48] sm:$0xff] }
 0x48f   : > { %2132 = vrot.lane.b32.xlu0 %v2131_v10, %s2288_s8  ;;  %2137 = vrot.lane.b32.xlu1 %v2126_v4, %s2289_s11 }
 0x493   : > { %2142 = vrot.lane.b32.xlu0 %v2131_v10, %s2289_s11  ;;  %855 = vperm.xlu1 %2085, %v1476_v11   ;;  %v1498_v10 = vld [vmem:[%s2873_s3 + $0x50] sm:$0xff]  ;;  %v1499_v11 = vld [vmem:[%s2873_s3 + $0x58] sm:$0xff] }
 0x497   : > { %860 = vperm.xlu0 %2084, %v1477_v12   ;;  %865 = vperm.xlu1 %2085, %v1478_v13  }
 0x49b   : > { %870 = vperm.xlu0 %2084, %v1479_v15  }
 0x4fd   : > { %v2128_v16 = vpop.permute.xlu1 %2127 }
 0x4fe   : > { %v2130_v17 = vunpack.i.h.bf16 %v2128_v16  ;;  %v2129_v18 = vunpack.i.l.bf16 %v2128_v16 }
 0x500   : > { %v1911_v19 = vpack.c.bf16 %v2130_v17, %v2129_v18 }
 0x501   : > { %v2133_v20 = vpop.permute.xlu0 %2132  ;;  %v2138_v24 = vpop.permute.xlu1 %2137 }
 0x502   : > { %v2135_v21 = vunpack.i.h.bf16 %v2133_v20  ;;  %v2134_v22 = vunpack.i.l.bf16 %v2133_v20  ;;  %1913 = vmatprep.subr.msk.bf16.mxu1 %vm2504_vm6, %v1911_v19  ;;  %v2140_v25 = vunpack.i.h.bf16 %v2138_v24  ;;  %v2139_v26 = vunpack.i.l.bf16 %v2138_v24 }
 0x503   : > { %1916 = vmatpush3.bf16.msk.msra.mxu1 %vm2504_vm6, %v1911_v19 }
 0x504   : > { %v1917_v23 = vpack.c.bf16 %v2135_v21, %v2134_v22  ;;  %v1931_v29 = vpack.c.bf16 %v2140_v25, %v2139_v26 }
 0x505   : > { %v2143_v27 = vpop.permute.xlu0 %2142 }
 0x506   : > { %1919 = vmatprep.subr.msk.bf16.mxu1 %vm2504_vm6, %v1917_v23  ;;  %v2145_v30 = vunpack.i.h.bf16 %v2143_v27  ;;  %v2144_v31 = vunpack.i.l.bf16 %v2143_v27 }
 0x507   : > { %1922 = vmatpush3.bf16.msk.msra.mxu1 %vm2504_vm6, %v1917_v23 }
 0x508   : > { %1924 = vmatprep.subr.bf16.mxu1 %v1923_v7  ;;  %v1937_v33 = vpack.c.bf16 %v2145_v30, %v2144_v31  ;;  %v1495_v30 = vld [vmem:[%s2872_s2 + $0x58] sm:$0xff] }
 0x50b   : > { %1926 = vmatpush3.bf16.msra.mxu1 %v1923_v7 }
 0x50c   : > { %1928 = vmatprep.subr.bf16.mxu1 %v1927_v5 }
 0x50f   : > { %1930 = vmatpush3.bf16.msra.mxu1 %v1927_v5  ;;  %v1492_v5 = vld [vmem:[%s2872_s2 + $0x40] sm:$0xff] }
 0x510   : > { %1933 = vmatprep.subr.msk.bf16.mxu1 %vm2517_vm8, %v1931_v29  ;;  %1779 = vmatprep.mubr.msk.f32.mxu0 %vm367_vm4, %v1492_v5 }
 0x512   : > { %v856_v38 = vpop.permute.xlu1 %855 }
 0x513   : > { %1936 = vmatpush3.bf16.msk.msra.mxu1 %vm2517_vm8, %v1931_v29  ;;  %v1493_v29 = vld [vmem:[%s2872_s2 + $0x48] sm:$0xff] }
 0x514   : > { %1939 = vmatprep.subr.msk.bf16.mxu1 %vm2517_vm8, %v1937_v33 }
 0x516   : > { %v861_v37 = vpop.permute.xlu0 %860  ;;  %v866_v48 = vpop.permute.xlu1 %865 }
 0x517   : > { %1942 = vmatpush3.bf16.msk.msra.mxu1 %vm2517_vm8, %v1937_v33 }
 0x51a   : > { %1750 = vmatmul.mubr.msk.f32.vlgmr.msra.gmra.mrb[4].mxu1 %vm367_vm4, %v1473_v34  ;;  %v871_v44 = vpop.permute.xlu0 %870 }
 0x51b   : > { %1752 = vmatprep.mubr.msk.f32.mxu1 %vm367_vm4, %v1474_v35 }
 0x51e   : > { %1753 = vmatmul.mubr.msk.f32.gmra.mrb[6].mxu1 %vm367_vm4, %v1475_v36 }
 0x5ed   : > { %v1751_v39 = vpop.f32.mrb[4].mxu1 }
 0x5ee   : > { %v957_v40 = vadd.f32 %v1751_v39, %v861_v37  ;;  %v951_v41 = vpop.f32.mrb[5].mxu1 }
 0x5ef   : > { %v952_v42 = vadd.f32 %v951_v41, %v856_v38 }
 0x5f0   : > { %v2704_v43 = vadd.f32 %v957_v40, %v2594_v52 }
 0x5f1   : > { %v2707_v46 = vadd.f32 %v952_v42, %v2597_v54  ;;  %v1754_v47 = vpop.f32.mrb[6].mxu1 }
 0x5f2   : > { %vm975_vm12 = vcmp.gt.f32.partialorder %v2704_v43, 0.0  ;;  %v979_v49 = vmul.f32 0.1, %v2704_v43  ;;  %v967_v50 = vadd.f32 %v1754_v47, %v871_v44  ;;  %v961_v51 = vpop.f32.mrb[7].mxu1 }
 0x5f3   : > { %vm974_vm13 = vcmp.gt.f32.partialorder %v2707_v46, 0.0  ;;  %v978_v53 = vmul.f32 0.1, %v2707_v46  ;;  %v962_v55 = vadd.f32 %v961_v51, %v866_v48 }
 0x5f4   : > { %v2714_v52 = vadd.f32 %v967_v50, %v2604_v1  ;;  %v983_v56 = vsel %vm975_vm12, %v2704_v43, %v979_v49 }
 0x5f5   : > { %v2718_v54 = vadd.f32 %v962_v55, %v2608_v0  ;;  %v982_v57 = vsel %vm974_vm13, %v2707_v46, %v978_v53  ;;  %v987_v58 = vmul.f32 %v2459_v2, %v983_v56 }
 0x5f6   : > { %vm977_vm14 = vcmp.gt.f32.partialorder %v2714_v52, 0.0  ;;  %v981_v59 = vmul.f32 0.1, %v2714_v52  ;;  %v986_v60 = vmul.f32 %v2459_v2, %v982_v57 }
 0x5f7   : > { %vm976_vm15 = vcmp.gt.f32.partialorder %v2718_v54, 0.0  ;;  %v980_v1 = vmul.f32 0.1, %v2718_v54 }
 0x5f8   : > { %v2146_v61 = vpack.i.bf16 %v987_v58, %v986_v60  ;;  %v985_v62 = vsel %vm977_vm14, %v2714_v52, %v981_v59  ;;  %v1955_v63 = vpack.c.bf16 %v987_v58, %v986_v60 }
 0x5f9   : > { %v984_v0 = vsel %vm976_vm15, %v2718_v54, %v980_v1  ;;  %v989_v3 = vmul.f32 %v2459_v2, %v985_v62 }
 0x5fa   : > { %2147 = vrot.lane.b32.xlu1 %v2146_v61, %s2293_s7  ;;  %v988_v4 = vmul.f32 %v2459_v2, %v984_v0  ;;  %v1516_v0 = vld [vmem:[%s2875_s5 + $0x40] sm:$0xff] }
 0x5fc   : > { %v2151_v7 = vpack.i.bf16 %v989_v3, %v988_v4  ;;  %v1959_v6 = vpack.c.bf16 %v989_v3, %v988_v4  ;;  %v1517_v3 = vld [vmem:[%s2875_s5 + $0x48] sm:$0xff]  ;;  %v1512_v4 = vld [vmem:[%s2874_s4 + $0x40] sm:$0xff] }
 0x5fd   : > { %1809 = vmatprep.mubr.msk.f32.mxu1 %vm367_vm4, %v1512_v4 }
 0x5fe   : > { %2152 = vrot.lane.b32.xlu0 %v2151_v7, %s2293_s7  ;;  %2157 = vrot.lane.b32.xlu1 %v2146_v61, %s2294_s26  ;;  %s280_s7 = scalar_lea.vmem [#allocation5], %s2888_s17 }
 0x602   : > { %2162 = vrot.lane.b32.xlu0 %v2151_v7, %s2294_s26  ;;  %1028 = vperm.xlu1 %2085, %v1496_v8   ;;  %v1519_v7 = vld [vmem:[%s2875_s5 + $0x58] sm:$0xff]  ;;  %s1336_s26 = sshll.u32 %s280_s7, 4  ;;  %s2820_s26 = int_to_ptr.vmem [resolvable:$true] %s1336_s26 }
 0x603   : > { %s2217_s13 = scalar_lea.vmem %s2820_s26, 512 }
 0x604   : > { %p2218_p6 = scmp.ne.s32.totalorder %s2820_s26, %s2217_s13 }
 0x606   : > { %1033 = vperm.xlu0 %2084, %v1497_v9   ;;  %1038 = vperm.xlu1 %2085, %v1498_v10   ;;  %p2219_p13 = pnand %p2218_p6, %p2889_p12 }
 0x608   : > { %p2220_p8 = pneg %p2219_p13 }
 0x60a   : > { %1043 = vperm.xlu0 %2084, %v1499_v11  }
 0x66c   : > { %v2148_v12 = vpop.permute.xlu1 %2147 }
 0x66d   : > { %v2150_v13 = vunpack.i.h.bf16 %v2148_v12  ;;  %v2149_v14 = vunpack.i.l.bf16 %v2148_v12 }
 0x66f   : > { %v1943_v15 = vpack.c.bf16 %v2150_v13, %v2149_v14 }
 0x670   : > { %v2153_v16 = vpop.permute.xlu0 %2152  ;;  %v2158_v20 = vpop.permute.xlu1 %2157 }
 0x671   : > { %v2155_v17 = vunpack.i.h.bf16 %v2153_v16  ;;  %v2154_v18 = vunpack.i.l.bf16 %v2153_v16  ;;  %1945 = vmatprep.subr.msk.bf16.mxu0 %vm1944_vm1, %v1943_v15  ;;  %v2160_v21 = vunpack.i.h.bf16 %v2158_v20  ;;  %v2159_v22 = vunpack.i.l.bf16 %v2158_v20 }
 0x672   : > { %1948 = vmatpush3.bf16.msk.msra.mxu0 %vm1944_vm1, %v1943_v15 }
 0x673   : > { %v1949_v19 = vpack.c.bf16 %v2155_v17, %v2154_v18  ;;  %v1963_v24 = vpack.c.bf16 %v2160_v21, %v2159_v22  ;;  %v1514_v22 = vld [vmem:[%s2874_s4 + $0x50] sm:$0xff] }
 0x674   : > { %v2163_v23 = vpop.permute.xlu0 %2162 }
 0x675   : > { %1951 = vmatprep.subr.msk.bf16.mxu0 %vm1944_vm1, %v1949_v19  ;;  %v2165_v25 = vunpack.i.h.bf16 %v2163_v23  ;;  %v2164_v26 = vunpack.i.l.bf16 %v2163_v23  ;;  %v1515_v23 = vld [vmem:[%s2874_s4 + $0x58] sm:$0xff] }
 0x676   : > { %1954 = vmatpush3.bf16.msk.msra.mxu0 %vm1944_vm1, %v1949_v19 }
 0x677   : > { %1956 = vmatprep.subr.bf16.mxu0 %v1955_v63  ;;  %v1969_v27 = vpack.c.bf16 %v2165_v25, %v2164_v26 }
 0x67a   : > { %1958 = vmatpush3.bf16.msra.mxu0 %v1955_v63 }
 0x67b   : > { %1960 = vmatprep.subr.bf16.mxu0 %v1959_v6 }
 0x67e   : > { %1962 = vmatpush3.bf16.msra.mxu0 %v1959_v6 }
 0x67f   : > { %1965 = vmatprep.subr.msk.bf16.mxu0 %vm1964_vm3, %v1963_v24 }
 0x681   : > { %v1029_v33 = vpop.permute.xlu1 %1028 }
 0x682   : > { %1968 = vmatpush3.bf16.msk.msra.mxu0 %vm1964_vm3, %v1963_v24 }
 0x683   : > { %1971 = vmatprep.subr.msk.bf16.mxu0 %vm1964_vm3, %v1969_v27 }
 0x685   : > { %v1034_v31 = vpop.permute.xlu0 %1033  ;;  %v1039_v42 = vpop.permute.xlu1 %1038 }
 0x686   : > { %1974 = vmatpush3.bf16.msk.msra.mxu0 %vm1964_vm3, %v1969_v27 }
 0x689   : > { %1780 = vmatmul.mubr.msk.f32.vlgmr.msra.gmra.mrb[8].mxu0 %vm367_vm4, %v1493_v29  ;;  %v1044_v39 = vpop.permute.xlu0 %1043 }
 0x68a   : > { %1782 = vmatprep.mubr.msk.f32.mxu0 %vm367_vm4, %v1494_v28 }
 0x68d   : > { %1783 = vmatmul.mubr.msk.f32.gmra.mrb[10].mxu0 %vm367_vm4, %v1495_v30 }
 0x75c   : > { %v1781_v34 = vpop.f32.mrb[8].mxu0 }
 0x75d   : > { %v1130_v35 = vadd.f32 %v1781_v34, %v1034_v31  ;;  %v1124_v36 = vpop.f32.mrb[9].mxu0 }
 0x75e   : > { %v1125_v37 = vadd.f32 %v1124_v36, %v1029_v33 }
 0x75f   : > { %vm1144_vm5 = vcmp.gt.f32.partialorder %v1130_v35, 0.0  ;;  %v1148_v38 = vmul.f32 0.1, %v1130_v35 }
 0x760   : > { %vm1143_vm7 = vcmp.gt.f32.partialorder %v1125_v37, 0.0  ;;  %v1147_v40 = vmul.f32 0.1, %v1125_v37  ;;  %v1784_v41 = vpop.f32.mrb[10].mxu0 }
 0x761   : > { %v1152_v44 = vsel %vm1144_vm5, %v1130_v35, %v1148_v38  ;;  %v1140_v47 = vadd.f32 %v1784_v41, %v1044_v39  ;;  %v1134_v48 = vpop.f32.mrb[11].mxu0  ;;  %v2186_v35 = vld [vmem:[%s2452_s20] ss:$0 sm:$0xff] }
 0x762   : > { %v1156_v49 = vmul.f32 %v2459_v2, %v1152_v44  ;;  %v1151_v50 = vsel %vm1143_vm7, %v1125_v37, %v1147_v40  ;;  %v1135_v51 = vadd.f32 %v1134_v48, %v1039_v42 }
 0x763   : > { %v1155_v53 = vmul.f32 %v2459_v2, %v1151_v50  ;;  %vm1146_vm9 = vcmp.gt.f32.partialorder %v1140_v47, 0.0  ;;  %v1150_v55 = vmul.f32 0.1, %v1140_v47 }
 0x764   : > { %vm1145_vm10 = vcmp.gt.f32.partialorder %v1135_v51, 0.0  ;;  %v1149_v56 = vmul.f32 0.1, %v1135_v51 }
 0x765   : > { %v1154_v57 = vsel %vm1146_vm9, %v1140_v47, %v1150_v55  ;;  %v2166_v58 = vpack.i.bf16 %v1156_v49, %v1155_v53  ;;  %v1987_v59 = vpack.c.bf16 %v1156_v49, %v1155_v53 }
 0x766   : > { %v1158_v60 = vmul.f32 %v2459_v2, %v1154_v57  ;;  %v1153_v1 = vsel %vm1145_vm10, %v1135_v51, %v1149_v56 }
 0x767   : > { %v1157_v61 = vmul.f32 %v2459_v2, %v1153_v1  ;;  %2167 = vrot.lane.b32.xlu1 %v2166_v58, %s2288_s8  ;;  %v1518_v2 = vld [vmem:[%s2875_s5 + $0x50] sm:$0xff] }
 0x769   : > { %v2171_v62 = vpack.i.bf16 %v1158_v60, %v1157_v61  ;;  %v1991_v63 = vpack.c.bf16 %v1158_v60, %v1157_v61 }
 0x76b   : > { %2172 = vrot.lane.b32.xlu0 %v2171_v62, %s2288_s8  ;;  %2177 = vrot.lane.b32.xlu1 %v2166_v58, %s2289_s11  ;;  %s1538_s8 = sshll.u32 %s2354_s25, 9  ;;  %s1323_s25 = scalar_lea.sflag [#allocation4], %s2437_s29 }
 0x76c   : > { %s2826_s12 = scalar_lea.hbm %s2876_s6, %s1538_s8 }
 0x76f   : > { %2182 = vrot.lane.b32.xlu0 %v2171_v62, %s2289_s11  ;;  %1195 = vperm.xlu1 %2085, %v1516_v0   ;;  %s2295_s11 = smov [#allocation5]  }
 0x770   : > { %s2221_s16 = sshll.u32 %s2295_s11, 4  ;;  %s2222_s16 = int_to_ptr.vmem [resolvable:$false] %s2221_s16 }
 0x771   : > { %s2223_s18 = scalar_lea.vmem %s2222_s16, 1024  ;;  %p2224_p10 = scmp.lt.s32.totalorder %s2820_s26, %s2222_s16 }
 0x772   : > { %p2225_p0 = scmp.lt.s32.totalorder %s2223_s18, %s2217_s13 }
 0x773   : > { %1200 = vperm.xlu0 %2084, %v1517_v3   ;;  %1205 = vperm.xlu1 %2085, %v1518_v2  }
 0x774   : > { %p2226_p2 = por %p2225_p0, %p2224_p10 }
 0x776   : > { %p2227_p4 = pnand %p2226_p2, %p2220_p8 }
 0x777   : > { %1210 = vperm.xlu0 %2084, %v1519_v7  }
 0x7d9   : > { %v2168_v6 = vpop.permute.xlu1 %2167 }
 0x7da   : > { %v2170_v8 = vunpack.i.h.bf16 %v2168_v6  ;;  %v2169_v9 = vunpack.i.l.bf16 %v2168_v6 }
 0x7dc   : > { %v1975_v10 = vpack.c.bf16 %v2170_v8, %v2169_v9 }
 0x7dd   : > { %v2173_v5 = vpop.permute.xlu0 %2172  ;;  %v2178_v14 = vpop.permute.xlu1 %2177 }
 0x7de   : > { %v2175_v11 = vunpack.i.h.bf16 %v2173_v5  ;;  %v2174_v12 = vunpack.i.l.bf16 %v2173_v5  ;;  %1977 = vmatprep.subr.msk.bf16.mxu1 %vm2504_vm6, %v1975_v10  ;;  %v2180_v15 = vunpack.i.h.bf16 %v2178_v14  ;;  %v2179_v16 = vunpack.i.l.bf16 %v2178_v14 }
 0x7df   : > { %1980 = vmatpush3.bf16.msk.msra.mxu1 %vm2504_vm6, %v1975_v10 }
 0x7e0   : > { %v1981_v13 = vpack.c.bf16 %v2175_v11, %v2174_v12  ;;  %v1995_v18 = vpack.c.bf16 %v2180_v15, %v2179_v16 }
 0x7e1   : > { %v2183_v17 = vpop.permute.xlu0 %2182 }
 0x7e2   : > { %1983 = vmatprep.subr.msk.bf16.mxu1 %vm2504_vm6, %v1981_v13  ;;  %v2185_v19 = vunpack.i.h.bf16 %v2183_v17  ;;  %v2184_v20 = vunpack.i.l.bf16 %v2183_v17 }
 0x7e3   : > { %1986 = vmatpush3.bf16.msk.msra.mxu1 %vm2504_vm6, %v1981_v13 }
 0x7e4   : > { %1988 = vmatprep.subr.bf16.mxu1 %v1987_v59  ;;  %v2001_v21 = vpack.c.bf16 %v2185_v19, %v2184_v20 }
 0x7e7   : > { %1990 = vmatpush3.bf16.msra.mxu1 %v1987_v59 }
 0x7e8   : > { %1992 = vmatprep.subr.bf16.mxu1 %v1991_v63 }
 0x7eb   : > { %1994 = vmatpush3.bf16.msra.mxu1 %v1991_v63 }
 0x7ec   : > { %1997 = vmatprep.subr.msk.bf16.mxu1 %vm2517_vm8, %v1995_v18 }
 0x7ee   : > { %v1196_v24 = vpop.permute.xlu1 %1195 }
 0x7ef   : > { %2000 = vmatpush3.bf16.msk.msra.mxu1 %vm2517_vm8, %v1995_v18 }
 0x7f0   : > { %2003 = vmatprep.subr.msk.bf16.mxu1 %vm2517_vm8, %v2001_v21 }
 0x7f2   : > { %v1201_v45 = vpop.permute.xlu0 %1200  ;;  %v1206_v34 = vpop.permute.xlu1 %1205 }
 0x7f3   : > { %2006 = vmatpush3.bf16.msk.msra.mxu1 %vm2517_vm8, %v2001_v21 }
 0x7f6   : > { %1810 = vmatmul.mubr.msk.f32.vlgmr.msra.gmra.mrb[8].mxu1 %vm367_vm4, %v1513_v32  ;;  %v1211_v30 = vpop.permute.xlu0 %1210 }
 0x7f7   : > { %1812 = vmatprep.mubr.msk.f32.mxu1 %vm367_vm4, %v1514_v22 }
 0x7fa   : > { %1813 = vmatmul.mubr.msk.f32.gmra.mrb[10].mxu1 %vm367_vm4, %v1515_v23 }
 0x8c9   : > { %v1811_v25 = vpop.f32.mrb[8].mxu1 }
 0x8ca   : > { %v1297_v26 = vadd.f32 %v1811_v25, %v1201_v45  ;;  %v1291_v27 = vpop.f32.mrb[9].mxu1 }
 0x8cb   : > { %v1292_v29 = vadd.f32 %v1291_v27, %v1196_v24 }
 0x8cc   : > { %v1311_v28 = vadd.f32 %v1297_v26, %v2704_v43 }
 0x8cd   : > { %v1310_v31 = vadd.f32 %v1292_v29, %v2707_v46  ;;  %v1814_v33 = vpop.f32.mrb[10].mxu1 }
 0x8ce   : > { %v1315_v36 = vmul.f32 %v2186_v35, %v1311_v28  ;;  %v1307_v37 = vadd.f32 %v1814_v33, %v1211_v30  ;;  %v1301_v38 = vpop.f32.mrb[11].mxu1 }
 0x8cf   : > { %v1314_v39 = vmul.f32 %v2186_v35, %v1310_v31  ;;  %v1302_v40 = vadd.f32 %v1301_v38, %v1206_v34 }
 0x8d0   : > { %1319 = vst [vmem:[%s280_s7 + $0x8] sm:$0xff] %v1315_v36  ;;  %v1313_v43 = vadd.f32 %v1307_v37, %v2714_v52 }
 0x8d1   : > { %1318 = vst [vmem:[%s280_s7] sm:$0xff] %v1314_v39  ;;  %v1312_v46 = vadd.f32 %v1302_v40, %v2718_v54 }
 0x8d2   : > { %v1317_v41 = vmul.f32 %v2186_v35, %v1313_v43 }
 0x8d3   : > { %v1316_v42 = vmul.f32 %v2186_v35, %v1312_v46 }
 0x8d4   : > { %1321 = vst [vmem:[%s280_s7 + $0x18] sm:$0xff] %v1317_v41 }
 0x8d5   : > { %1320 = vst [vmem:[%s280_s7 + $0x10] sm:$0xff] %v1316_v42 }
 0x8d6   : > { %2230 = shalt.err (!%p2227_p4)
}
 0x8d7   : > { %s2231_s19 = scalar_lea.hbm %s2826_s12, 512  ;;  %s2235_s17 = scalar_lea.hbm %s2876_s6, 1024 }
 0x8d8   : > { %p2232_p5 = scmp.ne.s32.totalorder %s2826_s12, %s2231_s19  ;;  %p2236_p1 = scmp.lt.u32.totalorder %s2826_s12, %s2876_s6 }
 0x8d9   : > { %p2237_p3 = scmp.lt.u32.totalorder %s2235_s17, %s2231_s19  ;;  %p2239_p6 = scmp.lt.u32.totalorder %s2231_s19, %s2826_s12 }
 0x8da   : > { %p2233_p7 = pnand %p2232_p5, %p2889_p12 }
 0x8db   : > { %p2238_p11 = por %p2237_p3, %p2236_p1 }
 0x8dc   : > { %p2234_p9 = pneg %p2233_p7 }
 0x8dd   : > { %p2240_p13 = por %p2239_p6, %p2238_p11 }
 0x8df   : > { %p2241_p8 = pnand %p2240_p13, %p2234_p9 }
 0x8e1   : > { %2244 = shalt.err (!%p2241_p8)
}
 0x8e2   : > { %s2296_s20 = smov 128   ;;  %s2297_s28 = smov 8  }
 0x8e3   : > { %2009 = dma.vmem_to_hbm [thread:$0]  (%p2889_p12), %s2820_s26, 512, %s2826_s12, %s1323_s25, %s2296_s20, %s2296_s20, %s2297_s28  }
 0x8e4 PF: > { %s1351_s13 = sand.u32 1, %s2271_s21   ;;  %p2890_p10 = scmp.ne.s32.totalorder %s2882_s10, 0 }
 0x8e5   : > { %p2891_p0 = scmp.ge.s32.totalorder %s2283_s24, 2  ;;  %s1352_s11 = scalar_lea.sflag [#allocation4], %s1351_s13 }
 0x8e7   : > { %p2016_p2 = pnand %p2891_p0, %p2890_p10 }
 0x8e9   : > { %2266 = dma.done.wait (!%p2016_p2), %s1352_s11, 512  }
 0x8ea   : > { %2268 = vsyncadd (!%p2016_p2), %s1352_s11, 4294966784  ;;  %p19_p4 = scmp.ge.s32.totalorder %s2358_s27, 4   ;;  %s2892_s21 = smov %s2275_s22 }
 0x8eb   : > { %s2893_s22 = smov %s2279_s23  ;;  %s2894_s23 = smov %s2370_s30 }
 0x8ec   : > { %s2895_s24 = smov %s2358_s27  ;;  %21 = sbr.rel (!%p19_p4) target bundleno = 5 (0x5), region = 100 }
 0x8f3   :  { %1357 = vsyncpa [#allocation3], 1 }
 0x8f4   :  { %1359 = vsyncpa [#allocation3 + $0x1], 1 }
 0x8f5   :  { %1360 = vsyncpa [#allocation4], 1 }
 0x8f6   :  { %1362 = vsyncpa [#allocation4 + $0x1], 1 }

</bundles_post_ra>
